<compile_context>
chip_gen: v5e
topology: v5e:2x2
jax: 0.10.0
libtpu: 0.0.40
codegen_flags: <defaults>
</compile_context>

<pallas_src>
import functools
import numpy as np
import jax
import jax.numpy as jnp
from jax.experimental import pallas as pl
from jax.experimental.pallas import tpu as pltpu

F32 = jnp.float32
BF16 = jnp.bfloat16
_CONV_TARGET_M = 256          # target MXU M (= rows_per_step * out_width) for the convs
_VMEM_LIMIT = None

_F1D_NP = np.array([1.0, 3.0, 3.0, 1.0], np.float32) / 8.0   # setup_filter([1,3,3,1])
_F1D = tuple(float(v) for v in _F1D_NP)


def _vmem_limit():
    """Per-chip VMEM budget for pallas_call (3/4 of physical, 48 MiB fallback)."""
    global _VMEM_LIMIT
    if _VMEM_LIMIT is None:
        try:
            cap = int(pltpu.get_tpu_info().vmem_capacity_bytes)
            _VMEM_LIMIT = max(32 * 1024 * 1024, (cap * 3) // 4)
        except Exception:
            _VMEM_LIMIT = 48 * 1024 * 1024
    return _VMEM_LIMIT


def _round_up(x, m):
    return (x + m - 1) // m * m


def _largest_divisor_leq(n, cap):
    cap = max(1, min(cap, n))
    for d in range(cap, 0, -1):
        if n % d == 0:
            return d
    return 1


# ==================================================================================
# Kernel 1: tiled fused matmul  out = clamp(gain * act(x @ w + b))
# ==================================================================================
def _mm_kernel(*refs, act, gain, clamp, has_bias):
    if has_bias:
        x_ref, w_ref, b_ref, o_ref, acc_ref = refs
    else:
        x_ref, w_ref, o_ref, acc_ref = refs
        b_ref = None
    k = pl.program_id(2)

    @pl.when(k == 0)
    def _init():
        acc_ref[...] = jnp.zeros_like(acc_ref)

    acc_ref[...] += jnp.dot(x_ref[...], w_ref[...], preferred_element_type=jnp.float32)

    @pl.when(k == pl.num_programs(2) - 1)
    def _finalize():
        acc = acc_ref[...]
        if has_bias:
            acc = acc + b_ref[...]
        if act == 'lrelu':
            acc = jnp.where(acc >= 0.0, acc, 0.2 * acc)
        if gain != 1.0:
            acc = acc * gain
        if clamp is not None:
            acc = jnp.clip(acc, -clamp, clamp)
        o_ref[...] = acc.astype(o_ref.dtype)


def fused_matmul(x, w, b=None, act='linear', gain=1.0, clamp=None, out_dtype=BF16):
    """x: (M, K); w: (K, Np) bf16 pre-scaled (Np % 128 == 0); b: (Np,) or None."""
    M, K = x.shape
    Kw, Np = w.shape
    assert Kw == K and Np % 128 == 0
    x = x.astype(BF16)
    w = w.astype(BF16)

    tm = min(256, _round_up(M, 16))
    Mp = _round_up(M, tm)
    if K <= 512:
        tk, Kp = K, K
    else:
        tk = 512 if K % 512 == 0 else (256 if K % 256 == 0 else 128)
        Kp = _round_up(K, tk)
    tn = 256 if Np % 256 == 0 else 128

    if Mp != M or Kp != K:
        x = jnp.pad(x, ((0, Mp - M), (0, Kp - K)))
    if Kp != K:
        w = jnp.pad(w, ((0, Kp - K), (0, 0)))

    kernel = functools.partial(_mm_kernel, act=act, gain=float(gain),
                               clamp=None if clamp is None else float(clamp),
                               has_bias=b is not None)
    in_specs = [pl.BlockSpec((tm, tk), lambda i, j, k: (i, k)),
                pl.BlockSpec((tk, tn), lambda i, j, k: (k, j))]
    args = [x, w]
    if b is not None:
        in_specs.append(pl.BlockSpec((1, tn), lambda i, j, k: (0, j)))
        args.append(b.reshape(1, Np).astype(jnp.float32))

    out = pl.pallas_call(
        kernel,
        out_shape=jax.ShapeDtypeStruct((Mp, Np), out_dtype),
        grid=(Mp // tm, Np // tn, Kp // tk),
        in_specs=in_specs,
        out_specs=pl.BlockSpec((tm, tn), lambda i, j, k: (i, j)),
        scratch_shapes=[pltpu.VMEM((tm, tn), jnp.float32)],
        compiler_params=pltpu.CompilerParams(
            dimension_semantics=("parallel", "parallel", "arbitrary"),
            vmem_limit_bytes=_vmem_limit()),
    )(*args)
    return out[:M] if Mp != M else out


# ==================================================================================
# Kernel 2: direct NHWC convolution, row-blocked (th output rows per grid step)
#   grid = (N, Np//128, ho_out//th); weight tile and the resident input image stay
#   constant across the innermost (row-block) axis.
# ==================================================================================
def _conv_kernel(*refs, taps, th, wo, act, gain, clamp, has_bias, has_res):
    it = iter(refs)
    x_ref = next(it)
    w_ref = next(it)
    b_ref = next(it) if has_bias else None
    r_ref = next(it) if has_res else None
    o_ref = next(it)

    hb = pl.program_id(2)
    row0 = hb * th
    C = x_ref.shape[3]

    acc = None
    for t, (rbase, cstart) in enumerate(taps):
        patch = x_ref[0, pl.ds(row0 + rbase, th), pl.ds(cstart, wo), :]   # (th, wo, C)
        patch = patch.reshape(th * wo, C)
        part = jnp.dot(patch, w_ref[t], preferred_element_type=jnp.float32)
        acc = part if acc is None else acc + part                         # f32 accum chain
    if has_bias:
        acc = acc + b_ref[...]
    if act == 'lrelu':
        acc = jnp.where(acc >= 0.0, acc, 0.2 * acc)
    if gain != 1.0:
        acc = acc * gain
    if clamp is not None:
        acc = jnp.clip(acc, -clamp, clamp)
    acc = acc.reshape(th, wo, -1)
    if has_res:
        acc = acc + r_ref[0].astype(jnp.float32)
    o_ref[0] = acc.astype(o_ref.dtype)


def conv2d_direct(x, w_taps, b, *, taps, ho_out, wo_out, act='linear', gain=1.0,
                  clamp=None, residual=None):
    """Direct NHWC conv.  For output row block starting at hb*th, tap t reads
    x[n, hb*th + taps[t][0] : +th, taps[t][1] : +wo_out, :] @ w_taps[t].

    x: (N, Hx, Wx, C) bf16; w_taps: (ntaps, C, Np) bf16 (Np % 128 == 0);
    b: (Np,) f32 or None; residual: (N, ho_out, wo_out, Np) bf16, added after clamp.
    Returns (N, ho_out, wo_out, Np) bf16.
    """
    N, Hx, Wx, C = x.shape
    ntaps, Cw, Np = w_taps.shape
    assert Cw == C and ntaps == len(taps) and Np % 128 == 0
    x = x.astype(BF16)
    tn = 128
    th = _largest_divisor_leq(ho_out, max(1, _CONV_TARGET_M // max(1, wo_out)))
    hb_steps = ho_out // th

    kernel = functools.partial(
        _conv_kernel, taps=tuple(tuple(int(v) for v in t) for t in taps), th=int(th),
        wo=int(wo_out), act=act, gain=float(gain),
        clamp=None if clamp is None else float(clamp),
        has_bias=b is not None, has_res=residual is not None)

    in_specs = [pl.BlockSpec((1, Hx, Wx, C), lambda n, j, h: (n, 0, 0, 0)),
                pl.BlockSpec((ntaps, C, tn), lambda n, j, h: (0, 0, j))]
    args = [x, w_taps.astype(BF16)]
    if b is not None:
        in_specs.append(pl.BlockSpec((1, tn), lambda n, j, h: (0, j)))
        args.append(b.reshape(1, Np).astype(jnp.float32))
    if residual is not None:
        in_specs.append(pl.BlockSpec((1, th, wo_out, tn), lambda n, j, h: (n, h, 0, j)))
        args.append(residual.astype(BF16))

    # TODO(synk): whole padded image resident per sample; halo row tiling needed for very
    #             large resolutions on v7x.
    return pl.pallas_call(
        kernel,
        out_shape=jax.ShapeDtypeStruct((N, ho_out, wo_out, Np), BF16),
        grid=(N, Np // tn, hb_steps),
        in_specs=in_specs,
        out_specs=pl.BlockSpec((1, th, wo_out, tn), lambda n, j, h: (n, h, 0, j)),
        compiler_params=pltpu.CompilerParams(
            dimension_semantics=("parallel", "arbitrary", "arbitrary"),
            vmem_limit_bytes=_vmem_limit()),
    )(*args)


# ==================================================================================
# Kernel 3: NHWC separable low-pass, no transposes.
#   Row pass: out_rows = fh @ x viewed as (H, W*C)   (MXU matmul; arbitrary row mixing,
#             so blur + row-parity-permute or blur + stride-2 subsample fold in for free).
#   Col pass: fixed [1,3,3,1]/8 FIR with zero pad, via lane-aligned static slices of a
#             zero-padded VMEM scratch (C is a multiple of 128 so every slice is aligned).
# ==================================================================================
def _blur_nhwc_kernel(x_ref, fh_ref, o_ref, ypad_ref, *, W, C, wpad, wo_blur):
    Hb = fh_ref.shape[0]
    y = jnp.dot(fh_ref[...], x_ref[0], preferred_element_type=jnp.float32)   # (Hb, W*C)
    ypad_ref[:, 0:wpad * C] = jnp.zeros((Hb, wpad * C), BF16)
    ypad_ref[:, (wpad + W) * C:] = jnp.zeros((Hb, wpad * C), BF16)
    ypad_ref[:, wpad * C:(wpad + W) * C] = y.astype(BF16)
    acc = None
    for j, fj in enumerate(_F1D):
        term = ypad_ref[:, j * C:j * C + wo_blur * C].astype(jnp.float32) * fj
        acc = term if acc is None else acc + term
    o_ref[0] = acc.astype(o_ref.dtype)


def blur_nhwc(x, fh, wpad):
    """x: (N, H, W, C) bf16 NHWC -> (N, fh.shape[0], W + 2*wpad - 3, C) bf16."""
    N, H, W, C = x.shape
    assert C % 128 == 0
    Hb = fh.shape[0]
    wo_blur = W + 2 * wpad - 3
    xf = x.reshape(N, H, W * C).astype(BF16)
    out = pl.pallas_call(
        functools.partial(_blur_nhwc_kernel, W=W, C=C, wpad=int(wpad), wo_blur=wo_blur),
        out_shape=jax.ShapeDtypeStruct((N, Hb, wo_blur * C), BF16),
        grid=(N,),
        in_specs=[pl.BlockSpec((1, H, W * C), lambda n: (n, 0, 0)),
                  pl.BlockSpec((Hb, H), lambda n: (0, 0))],
        out_specs=pl.BlockSpec((1, Hb, wo_blur * C), lambda n: (n, 0, 0)),
        scratch_shapes=[pltpu.VMEM((Hb, (W + 2 * wpad) * C), BF16)],
        compiler_params=pltpu.CompilerParams(
            dimension_semantics=("parallel",),
            vmem_limit_bytes=_vmem_limit()),
    )(xf, fh.astype(BF16))
    return out.reshape(N, Hb, wo_blur, C)


# ==================================================================================
# Kernel 4: separable bilinear resize (image_raw path only; already channel-minor NCHW)
# ==================================================================================
def _sepfilter_kernel(x_ref, fh_ref, fw_ref, o_ref):
    x = x_ref[...]                                              # (tb, H, W) bf16
    tb, H, W = x.shape
    Wo = fw_ref.shape[0]
    # W pass with the batch folded into M (single matmul):
    xw = jnp.dot(x.reshape(tb * H, W), jnp.transpose(fw_ref[...], (1, 0)),
                 preferred_element_type=jnp.float32)            # (tb*H, Wo)
    xw = xw.reshape(tb, H, Wo).astype(x.dtype)
    # H pass (small batched matmul).
    fh = jnp.broadcast_to(fh_ref[...], (tb,) + fh_ref.shape)    # (tb, Ho, H)
    z = jnp.einsum('boh,bhw->bow', fh, xw, preferred_element_type=jnp.float32)
    o_ref[...] = z.astype(o_ref.dtype)


def separable_filter(x, fh, fw):
    """x: (B, H, W) -> (B, Ho, Wo) bf16, out[b] = fh @ x[b] @ fw.T."""
    B, H, W = x.shape
    Ho, Wo = fh.shape[0], fw.shape[0]
    cap = max(1, min(256, (4 * 1024 * 1024) // max(1, H * W * 2)))
    tb = _largest_divisor_leq(B, cap)
    return pl.pallas_call(
        _sepfilter_kernel,
        out_shape=jax.ShapeDtypeStruct((B, Ho, Wo), BF16),
        grid=(B // tb,),
        in_specs=[pl.BlockSpec((tb, H, W), lambda i: (i, 0, 0)),
                  pl.BlockSpec((Ho, H), lambda i: (0, 0)),
                  pl.BlockSpec((Wo, W), lambda i: (0, 0))],
        out_specs=pl.BlockSpec((tb, Ho, Wo), lambda i: (i, 0, 0)),
        compiler_params=pltpu.CompilerParams(
            dimension_semantics=("parallel",),
            vmem_limit_bytes=_vmem_limit()),
    )(x.astype(BF16), fh.astype(BF16), fw.astype(BF16))


# ==================================================================================
# Kernel 5: minibatch-std statistic
# ==================================================================================
def _mbstd_kernel(x_ref, o_ref):
    x = x_ref[...]                                     # (G, M, D)
    mu = jnp.mean(x, axis=0, keepdims=True)
    var = jnp.mean((x - mu) ** 2, axis=0)              # (M, D)
    sd = jnp.sqrt(var + 1e-8)
    o_ref[...] = jnp.mean(sd, axis=1, keepdims=True)   # (M, 1)


def minibatch_std_stat(x, group_size=4):
    """x: (N, H, W, C) -> per-sample stat (N, 1) f32."""
    N, H, W, C = x.shape
    G = min(group_size, N)
    assert N % G == 0, "batch must be divisible by the minibatch-std group size"
    M = N // G
    D = H * W * C
    xg = x.astype(jnp.float32).reshape(G, M, D)
    stat = pl.pallas_call(
        _mbstd_kernel,
        out_shape=jax.ShapeDtypeStruct((M, 1), jnp.float32),
        grid=(1,),
        in_specs=[pl.BlockSpec((G, M, D), lambda i: (0, 0, 0))],
        out_specs=pl.BlockSpec((M, 1), lambda i: (0, 0)),
        compiler_params=pltpu.CompilerParams(dimension_semantics=("arbitrary",),
                                             vmem_limit_bytes=_vmem_limit()),
    )(xg)
    return jnp.tile(stat, (G, 1))                      # (N, 1), row n = stat[n % M]


# ==================================================================================
# Host-side filter matrices and weight preprocessing
# ==================================================================================
def _blur_matrix(H, pad):
    Ho = H + 2 * pad - 3
    B = np.zeros((Ho, H), np.float32)
    for o in range(Ho):
        for t in range(4):
            i = o + t - pad
            if 0 <= i < H:
                B[o, i] += _F1D_NP[t]
    return B


def _bilinear_resize_matrix(out_size, in_size):
    # torch bilinear, align_corners=False; antialias=True is a no-op when upscaling.
    # TODO(synk): antialiased *downscale* branch of filtered_resizing not implemented.
    R = np.zeros((out_size, in_size), np.float32)
    scale = in_size / out_size
    for o in range(out_size):
        src = max((o + 0.5) * scale - 0.5, 0.0)
        i0 = int(np.floor(src))
        frac = src - i0
        i1 = min(i0 + 1, in_size - 1)
        i0 = min(i0, in_size - 1)
        R[o, i0] += 1.0 - frac
        R[o, i1] += frac
    return R


def _prep_conv_weight(w, weight_gain, c_pad, n_pad):
    # torch layout (O, C, kh, kw) -> (kh*kw, c_pad, n_pad) bf16, gain folded, zero-padded.
    O, C, kh, kw = w.shape
    wt = jnp.transpose(w, (2, 3, 1, 0)).reshape(kh * kw, C, O) * weight_gain
    wt = jnp.pad(wt, ((0, 0), (0, c_pad - C), (0, n_pad - O)))
    return wt.astype(BF16)


def _prep_fc_weight(w, weight_gain, n_pad):
    # torch layout (O, K) -> (K, n_pad) bf16, gain folded, out dim zero-padded.
    O, K = w.shape
    wt = w.T * weight_gain
    wt = jnp.pad(wt, ((0, 0), (0, n_pad - O)))
    return wt.astype(BF16)


# ==================================================================================
# StyleGAN2 layers
# ==================================================================================
class DiscriminatorBlockP:
    """StyleGAN2 DiscriminatorBlock, architecture='resnet'."""

    def __init__(self, key, in_channels, tmp_channels, out_channels, resolution,
                 img_channels, conv_clamp):
        ks = jax.random.split(key, 4)
        self.in_channels = in_channels
        self.res = resolution
        self.conv_clamp = conv_clamp
        self.Cp = _round_up(tmp_channels, 128)
        self.Np_tmp = _round_up(tmp_channels, 128)
        self.Np_out = _round_up(out_channels, 128)

        if in_channels == 0:
            w = jax.random.normal(ks[0], (tmp_channels, img_channels), jnp.float32)
            self.w_rgb = _prep_fc_weight(w, 1.0 / np.sqrt(img_channels), self.Np_tmp)
            self.b_rgb = jnp.zeros((self.Np_tmp,), jnp.float32)

        w0 = jax.random.normal(ks[1], (tmp_channels, tmp_channels, 3, 3), jnp.float32)
        self.w0 = _prep_conv_weight(w0, 1.0 / np.sqrt(tmp_channels * 9), self.Cp, self.Np_tmp)
        self.b0 = jnp.zeros((self.Np_tmp,), jnp.float32)

        w1 = jax.random.normal(ks[2], (out_channels, tmp_channels, 3, 3), jnp.float32)
        self.w1 = _prep_conv_weight(w1, 1.0 / np.sqrt(tmp_channels * 9), self.Cp, self.Np_out)
        self.b1 = jnp.zeros((self.Np_out,), jnp.float32)

        wsk = jax.random.normal(ks[3], (out_channels, tmp_channels), jnp.float32)
        w_skip = _prep_fc_weight(wsk, 1.0 / np.sqrt(tmp_channels), self.Np_out)
        self.w_skip = jnp.pad(w_skip, ((0, self.Cp - tmp_channels), (0, 0)))

        H = resolution
        # conv1 path low-pass: upfirdn2d pad = (fw-down+1)//2 + kw//2 = 2 each side ->
        # H+1 rows; rows emitted even-parity-first so the stride-2 conv taps read
        # contiguous th-row windows.
        b2 = _blur_matrix(H, 2)                       # (H+1, H)
        perm = list(range(0, H + 1, 2)) + list(range(1, H + 1, 2))
        self.fh_blur_perm = jnp.asarray(b2[perm], jnp.float32)
        self.He = H // 2 + 1                          # even-parity row count
        self.We = H // 2 + 1                          # even-parity col count (square imgs)
        # skip path low-pass: pad 1, stride-2 row subsample folded into the matrix.
        b1m = _blur_matrix(H, 1)                      # (H-1, H)
        self.fh_skip = jnp.asarray(b1m[0::2][:H // 2], jnp.float32)

        # taps = (row_base, col_start): tap reads rows [hb*th + row_base, +th),
        # cols [col_start, +wo_out).
        self.taps_s1 = tuple((dh, dw) for dh in range(3) for dw in range(3))
        rb = {0: 0, 1: self.He, 2: 1}
        cb = {0: 0, 1: self.We, 2: 1}
        self.taps_s2 = tuple((rb[dh], cb[dw]) for dh in range(3) for dw in range(3))

    def __call__(self, x, img):
        if self.in_channels == 0:
            N, Hi, Wi, Ci = img.shape
            y = fused_matmul(img.reshape(N * Hi * Wi, Ci), self.w_rgb, self.b_rgb,
                             act='lrelu', gain=np.sqrt(2.0), clamp=self.conv_clamp)
            y = y.reshape(N, Hi, Wi, self.Np_tmp)
            x = y if x is None else (x + y).astype(BF16)
            img = None   # resnet architecture drops img after fromrgb

        N, H, W, Cp = x.shape
        assert Cp == self.Cp and H == self.res and W == self.res
        Ho, Wo = H // 2, W // 2

        # --- skip branch: NHWC blur (row subsample in the matrix), host col subsample,
        #     1x1 conv; later fused into conv1's epilogue as the residual.
        xs = blur_nhwc(x, self.fh_skip, wpad=1)                  # (N, Ho, W-1, Cp)
        xs = xs[:, :, 0::2, :]                                   # (N, Ho, Wo, Cp)
        y = fused_matmul(xs.reshape(N * Ho * Wo, Cp), self.w_skip, None,
                         act='linear', gain=np.sqrt(0.5),
                         clamp=self.conv_clamp * np.sqrt(0.5))
        y = y.reshape(N, Ho, Wo, self.Np_out)

        # --- conv0: 3x3 stride-1 pad-1, lrelu
        # TODO(synk): boundary pad could be folded into the conv kernel to avoid this pass.
        x0 = conv2d_direct(jnp.pad(x, ((0, 0), (1, 1), (1, 1), (0, 0))),
                           self.w0, self.b0, taps=self.taps_s1,
                           ho_out=H, wo_out=W, act='lrelu', gain=np.sqrt(2.0),
                           clamp=self.conv_clamp)

        # --- conv1: NHWC blur (row parity folded into matrix), host W-parity concat,
        #     3x3 stride-2 conv with the skip-add fused into the epilogue.
        xb = blur_nhwc(x0, self.fh_blur_perm, wpad=2)            # (N, H+1, W+1, C)
        xb = jnp.concatenate([xb[:, :, 0::2, :], xb[:, :, 1::2, :]], axis=2)
        x1 = conv2d_direct(xb, self.w1, self.b1, taps=self.taps_s2,
                           ho_out=Ho, wo_out=Wo, act='lrelu', gain=1.0,  # sqrt(2)*sqrt(0.5)
                           clamp=self.conv_clamp * np.sqrt(0.5), residual=y)
        return x1, img


class DiscriminatorEpilogueP:
    """StyleGAN2 DiscriminatorEpilogue with cmap_dim == 0 (c_dim == 0 config)."""

    def __init__(self, key, in_channels, resolution, conv_clamp,
                 mbstd_group_size=4, mbstd_num_channels=1):
        ks = jax.random.split(key, 3)
        self.C = in_channels
        self.res = resolution
        self.conv_clamp = conv_clamp
        self.mbstd_group_size = mbstd_group_size
        self.mbstd_num_channels = mbstd_num_channels
        self.Np = _round_up(in_channels, 128)

        cin = in_channels + mbstd_num_channels
        self.cin_p = _round_up(cin, 128)       # mbstd channel lives in the padded lanes
        wc = jax.random.normal(ks[0], (in_channels, cin, 3, 3), jnp.float32)
        self.w_conv = _prep_conv_weight(wc, 1.0 / np.sqrt(cin * 9), self.cin_p, self.Np)
        self.b_conv = jnp.zeros((self.Np,), jnp.float32)

        kfc = in_channels * resolution * resolution
        wfc = jax.random.normal(ks[1], (in_channels, kfc), jnp.float32)
        self.w_fc = _prep_fc_weight(wfc, 1.0 / np.sqrt(kfc), self.Np)
        self.b_fc = jnp.zeros((self.Np,), jnp.float32)

        wo = jax.random.normal(ks[2], (1, in_channels), jnp.float32)
        self.w_out = _prep_fc_weight(wo, 1.0 / np.sqrt(in_channels), 128)
        self.b_out = jnp.zeros((128,), jnp.float32)

        self.taps_s1 = tuple((dh, dw) for dh in range(3) for dw in range(3))

    def __call__(self, x, img, cmap):
        N = x.shape[0]
        C = self.C
        Np_in = x.shape[-1]
        if self.cin_p > Np_in:
            x = jnp.pad(x, ((0, 0), (0, 0), (0, 0), (0, self.cin_p - Np_in)))
        # minibatch-std: write the statistic into an already-zero padded channel (index C)
        stat = minibatch_std_stat(x[..., :C], self.mbstd_group_size)    # (N, 1) f32
        onehot = jnp.zeros((self.cin_p,), BF16).at[C].set(1.0)
        x = x.astype(BF16) + stat.reshape(N, 1, 1, 1).astype(BF16) * onehot

        x = conv2d_direct(jnp.pad(x, ((0, 0), (1, 1), (1, 1), (0, 0))),
                          self.w_conv, self.b_conv, taps=self.taps_s1,
                          ho_out=self.res, wo_out=self.res, act='lrelu',
                          gain=np.sqrt(2.0), clamp=self.conv_clamp)
        x = x[..., :C]
        # match torch's NCHW .flatten(1) ordering (tiny tensor)
        x = jnp.transpose(x, (0, 3, 1, 2)).reshape(N, -1)
        x = fused_matmul(x, self.w_fc, self.b_fc, act='lrelu', gain=np.sqrt(2.0))
        x = x[:, :C]
        x = fused_matmul(x, self.w_out, self.b_out, act='linear', out_dtype=jnp.float32)
        return x[:, :1]


# ==================================================================================
# DummyDualDiscriminator
# ==================================================================================
class DummyDualDiscriminatorP:
    def __init__(self, key, c_dim, img_resolution, img_channels,
                 channel_base=32768, channel_max=512, conv_clamp=256):
        # TODO(synk): MappingNetwork / cmap conditioning only exists when c_dim > 0;
        # this config uses c_dim = 0 (cmap_dim = 0), matching the torch module logic.
        assert c_dim == 0
        img_channels *= 2
        self.c_dim = c_dim
        self.img_resolution = img_resolution
        self.img_resolution_log2 = int(np.log2(img_resolution))
        self.img_channels = img_channels
        self.block_resolutions = [2 ** i for i in range(self.img_resolution_log2, 2, -1)]
        channels_dict = {res: min(channel_base // res, channel_max)
                         for res in self.block_resolutions + [4]}
        keys = jax.random.split(key, len(self.block_resolutions) + 1)
        self.blocks = {}
        for kk, res in zip(keys[:-1], self.block_resolutions):
            in_channels = channels_dict[res] if res < img_resolution else 0
            self.blocks[res] = DiscriminatorBlockP(
                kk, in_channels, channels_dict[res], channels_dict[res // 2],
                res, img_channels, conv_clamp)
        self.b4 = DiscriminatorEpilogueP(keys[-1], channels_dict[4], 4, conv_clamp)
        self.raw_fade = 1.0
        self._resize_cache = {}

    def _resize_matrices(self, in_h, in_w, size):
        k = (in_h, in_w, size)
        if k not in self._resize_cache:
            self._resize_cache[k] = (jnp.asarray(_bilinear_resize_matrix(size, in_h)),
                                     jnp.asarray(_bilinear_resize_matrix(size, in_w)))
        return self._resize_cache[k]

    def __call__(self, img_dict, c):
        # Stateful fade, exactly as in the torch forward (update then use).
        # TODO(synk): under jax.jit this python float is baked at trace time and will not
        # decay per call; eager execution matches the torch stateful behaviour.
        self.raw_fade = max(0.0, self.raw_fade - 1.0 / (500000 / 32))

        image = jnp.asarray(img_dict['image'], jnp.float32)          # (N, 3, S, S) NCHW
        image_raw = jnp.asarray(img_dict['image_raw'], jnp.float32)  # (N, 3, h, w) NCHW
        N, Craw, rh, rw = image_raw.shape
        size = image.shape[-1]
        Rh, Rw = self._resize_matrices(rh, rw, size)
        raw_up = separable_filter(image_raw.reshape(N * Craw, rh, rw), Rh, Rw)
        raw_up = raw_up.reshape(N, Craw, size, size) * BF16(self.raw_fade)

        img = jnp.concatenate([image.astype(BF16), raw_up], axis=1)  # (N, 6, S, S) NCHW
        img = jnp.transpose(img, (0, 2, 3, 1))                       # NHWC for the conv stack
        x = None
        for res in self.block_resolutions:
            x, img = self.blocks[res](x, img)
        del c  # c_dim == 0 -> no cmap
        return self.b4(x, img, None)


# ==================================================================================
if __name__ == "__main__":
    key = jax.random.PRNGKey(0)
    k_param, k_img, k_raw = jax.random.split(key, 3)

    B, C, RES, RAW = 2, 3, 16, 8   # small shapes: image 16x16, image_raw 8x8
    disc = DummyDualDiscriminatorP(k_param, c_dim=0, img_resolution=RES, img_channels=C,
                                   channel_base=512, channel_max=32, conv_clamp=256)

    img = {'image': jax.random.normal(k_img, (B, C, RES, RES), jnp.float32),
           'image_raw': jax.random.normal(k_raw, (B, C, RAW, RAW), jnp.float32)}
    c = jnp.zeros((B, 0), jnp.float32)

    out = disc(img, c)
    jax.block_until_ready(out)
    assert out.shape == (B, 1) and out.dtype == jnp.float32
    print("KERNEL_OK")
</pallas_src>

<mosaic_0001>
module attributes {stable_mosaic.version = 11 : i64} {
  func.func @_sepfilter_kernel(%arg0: i32, %arg1: memref<6x8x8xbf16, #tpu.memory_space<vmem>>, %arg2: memref<16x8xbf16, #tpu.memory_space<vmem>>, %arg3: memref<16x8xbf16, #tpu.memory_space<vmem>>, %arg4: memref<6x16x16xbf16, #tpu.memory_space<vmem>>) attributes {dimension_semantics = [#tpu.dimension_semantics<parallel>], iteration_bounds = array<i64: 1>, scalar_prefetch = 0 : i64, scratch_operands = 0 : i64, tpu.core_type = #tpu.core_type<tc>, window_params = [{transform_indices = @transform_0, window_bounds = array<i64: 6, 8, 8>}, {pipeline_mode = #tpu.pipeline_mode<synchronous>, transform_indices = @transform_1, window_bounds = array<i64: 16, 8>}, {pipeline_mode = #tpu.pipeline_mode<synchronous>, transform_indices = @transform_2, window_bounds = array<i64: 16, 8>}, {transform_indices = @transform_3, window_bounds = array<i64: 6, 16, 16>}]} {
    %c0 = arith.constant 0 : index
    %c0_0 = arith.constant 0 : index
    %c0_1 = arith.constant 0 : index
    %0 = vector.load %arg1[%c0, %c0_0, %c0_1] : memref<6x8x8xbf16, #tpu.memory_space<vmem>>, vector<6x8x8xbf16>
    %1 = vector.shape_cast %0 : vector<6x8x8xbf16> to vector<48x8xbf16>
    %c0_2 = arith.constant 0 : index
    %c0_3 = arith.constant 0 : index
    %2 = vector.load %arg3[%c0_2, %c0_3] : memref<16x8xbf16, #tpu.memory_space<vmem>>, vector<16x8xbf16>
    %3 = tpu.transpose %2, [1, 0] : vector<16x8xbf16> -> vector<8x16xbf16>
    %cst = arith.constant dense<0.000000e+00> : vector<48x16xf32>
    %4 = tpu.matmul %1, %3, %cst {dimension_numbers = #tpu.dot_dimension_numbers<[1], [0], [0], [1], [0, 0, 1, 1], [], []>} : vector<48x8xbf16>, vector<8x16xbf16>, vector<48x16xf32> -> vector<48x16xf32>
    %5 = vector.shape_cast %4 : vector<48x16xf32> to vector<6x8x16xf32>
    %6 = arith.truncf %5 : vector<6x8x16xf32> to vector<6x8x16xbf16>
    %c0_4 = arith.constant 0 : index
    %c0_5 = arith.constant 0 : index
    %7 = vector.load %arg2[%c0_4, %c0_5] : memref<16x8xbf16, #tpu.memory_space<vmem>>, vector<16x8xbf16>
    %8 = vector.shape_cast %7 : vector<16x8xbf16> to vector<1x16x8xbf16>
    %9 = vector.broadcast %8 : vector<1x16x8xbf16> to vector<6x16x8xbf16>
    "tpu.trace_start"() <{level = 10 : i32, message = "boh,bhw->bow"}> : () -> ()
    %cst_6 = arith.constant dense<0.000000e+00> : vector<6x16x16xf32>
    %10 = tpu.matmul %9, %6, %cst_6 {dimension_numbers = #tpu.dot_dimension_numbers<[2], [1], [1], [2], [0, 0, 0, 1, 1, 2], [0], [0]>} : vector<6x16x8xbf16>, vector<6x8x16xbf16>, vector<6x16x16xf32> -> vector<6x16x16xf32>
    "tpu.trace_stop"() : () -> ()
    %11 = arith.truncf %10 : vector<6x16x16xf32> to vector<6x16x16xbf16>
    %c0_7 = arith.constant 0 : index
    %c0_8 = arith.constant 0 : index
    %c0_9 = arith.constant 0 : index
    %12 = vector.load %arg4[%c0_7, %c0_8, %c0_9] : memref<6x16x16xbf16, #tpu.memory_space<vmem>>, vector<6x16x16xbf16>
    tpu.vector_store %arg4[%c0_7, %c0_8, %c0_9], %11 {strides = array<i32>} : memref<6x16x16xbf16, #tpu.memory_space<vmem>>, vector<6x16x16xbf16>,
    return
  }
  func.func @transform_0(%arg0: i32) -> (i32, i32, i32) {
    %c0_i32 = arith.constant 0 : i32
    %c0_i32_0 = arith.constant 0 : i32
    %c0_i32_1 = arith.constant 0 : i32
    return %arg0, %c0_i32, %c0_i32_0 : i32, i32, i32
  }
  func.func @transform_1(%arg0: i32) -> (i32, i32) {
    %c0_i32 = arith.constant 0 : i32
    %c0_i32_0 = arith.constant 0 : i32
    %c0_i32_1 = arith.constant 0 : i32
    return %c0_i32, %c0_i32_0 : i32, i32
  }
  func.func @transform_2(%arg0: i32) -> (i32, i32) {
    %c0_i32 = arith.constant 0 : i32
    %c0_i32_0 = arith.constant 0 : i32
    %c0_i32_1 = arith.constant 0 : i32
    return %c0_i32, %c0_i32_0 : i32, i32
  }
  func.func @transform_3(%arg0: i32) -> (i32, i32, i32) {
    %c0_i32 = arith.constant 0 : i32
    %c0_i32_0 = arith.constant 0 : i32
    %c0_i32_1 = arith.constant 0 : i32
    return %arg0, %c0_i32, %c0_i32_0 : i32, i32, i32
  }
}

</mosaic_0001>

<bundles_post_ra>
// kernel: tpu_custom_call.1
= control target key start
LH: loop header
LB: loop body
LE: loop exit
PB: predicated region body
PF: predicated region fallthrough
CT: control target
= control target key end

     0   :  { %8 = vsyncpa [#allocation3], 0  ;;  %s420_s0 = inlined_call_operand.hbm [shape: bf16[6,8,8], index: 0, kind: input, shape index: {}]   ;;  %s421_s1 = inlined_call_operand.vmem [shape: bf16[16,8], index: 1, kind: input, shape index: {}]   ;;  %s422_s2 = inlined_call_operand.vmem [shape: bf16[16,8], index: 2, kind: input, shape index: {}]   ;;  %s423_s3 = inlined_call_operand.hbm [shape: bf16[6,16,16], index: 3, kind: output, shape index: {}]  }
   0x1   :  { %9 = vsyncpa [#allocation4], 0  ;;  %s14_s14 = sshll.u32 %s420_s0, 4  ;;  %s350_s15 = smov [#allocation2]   ;;  %s15_s14 = int_to_ptr.hbm [resolvable:$true] %s14_s14 }
   0x2   :  { %s16_s16 = sshll.u32 %s350_s15, 4  ;;  %s351_s17 = smov 64   ;;  %s17_s16 = int_to_ptr.vmem [resolvable:$true] %s16_s16 }
   0x3   :  { %s352_s18 = smov 4  }
   0x4   :  { %22 = dma.hbm_to_vmem [thread:$0]  %s15_s14, 384, %s17_s16, [#allocation3], %s351_s17, %s351_s17, %s352_s18  }
   0x5   :  { %346 = dma.done.wait [#allocation3], 384  }
   0x6   :  { %347 = vsyncadd [#allocation3], 4294966912  ;;  %vm60_vm0 = vcmask 64512   ;;  %v292_v0 = vld [vmem:[%s422_s2] sm:$0xff]  ;;  %v290_v3 = vld [vmem:[#allocation2 + $0x8] sm:$0xff]  ;;  %vm113_vm1 = vcmask 1043456  }
   0x7   :  { %v71_v1 = vsel %vm60_vm0, %v292_v0, 0  ;;  %v289_v2 = vld [vmem:[#allocation2] sm:$0xff]  ;;  %v291_v4 = vld [vmem:[#allocation2 + $0x10] sm:$0xff]  ;;  %vm228_vm2 = vcmask 125952   ;;  %s247_s24 = sshll.u32 %s423_s3, 4  ;;  %s248_s24 = int_to_ptr.hbm [resolvable:$true] %s247_s24 }
   0x8   :  { %80 = vmatpush.bf16.xpose.msra.mxu0 %v71_v1  ;;  %v293_v8 = vld [vmem:[%s421_s1] sm:$0xff]  ;;  %s353_s1 = smov [#allocation5]  }
   0x9   :  { %s245_s21 = sshll.u32 %s353_s1, 4  ;;  %s246_s21 = int_to_ptr.vmem [resolvable:$true] %s245_s21 }
   0xf   :  { %276 = vmatmul.msk.bf16.vlgmr.msra.gmra.mxu0 %vm60_vm0, %v289_v2 }
  0x1f   :  { %277 = vmatmul.msk.bf16.gmra.mxu0 %vm60_vm0, %v290_v3 }
  0x2f   :  { %278 = vmatmul.msk.bf16.gmra.mxu0 %vm60_vm0, %v291_v4 }
  0x8c   :  { %v82_v5 = vpop.f32.mrf.mxu0 }
  0x8d   :  { %v97_v6 = vpack.c.bf16 %v82_v5, %v82_v5 }
  0x8f   :  { %v115_v7 = vsel %vm113_vm1, %v97_v6, 0 }
  0x90   :  { %124 = vmatpush.bf16.msra.mxu1 %v115_v7 }
  0x93   :  { %283 = vmatmul.msk.bf16.vlgmr.msra.gmra.mxu1 %vm60_vm0, %v293_v8 }
  0x94   :  { %v84_v9 = vpop.f32.mrf.mxu0 }
  0x95   :  { %v98_v10 = vpack.c.bf16 %v84_v9, %v84_v9 }
  0x97   :  { %v132_v11 = vsel %vm113_vm1, %v98_v10, 0 }
  0x98   :  { %141 = vmatpush.bf16.msra.mxu2 %v132_v11 }
  0x9b   :  { %284 = vmatmul.msk.bf16.vlgmr.msra.gmra.mxu2 %vm60_vm0, %v293_v8 }
  0x9c   :  { %v87_v12 = vpop.f32.mrf.mxu0 }
  0x9d   :  { %v99_v13 = vpack.c.bf16 %v87_v12, %v87_v12 }
  0x9f   :  { %v149_v14 = vsel %vm113_vm1, %v99_v13, 0 }
  0xa0   :  { %158 = vmatpush.bf16.msra.mxu3 %v149_v14 }
  0xa3   :  { %285 = vmatmul.msk.bf16.vlgmr.msra.gmra.mxu3 %vm60_vm0, %v293_v8 }
  0xa4   :  { %v89_v15 = vpop.f32.mrf.mxu0 }
  0xa5   :  { %v100_v16 = vpack.c.bf16 %v89_v15, %v89_v15 }
  0xa7   :  { %v166_v17 = vsel %vm113_vm1, %v100_v16, 0 }
  0xa8   :  { %175 = vmatpush.bf16.msrb.mxu1 %v166_v17 }
  0xab   :  { %286 = vmatmul.msk.bf16.vlgmr.msrb.gmra.mxu1 %vm60_vm0, %v293_v8 }
  0xac   :  { %v92_v18 = vpop.f32.mrf.mxu0 }
  0xad   :  { %v101_v19 = vpack.c.bf16 %v92_v18, %v92_v18 }
  0xaf   :  { %v183_v20 = vsel %vm113_vm1, %v101_v19, 0 }
  0xb0   :  { %192 = vmatpush.bf16.msrb.mxu2 %v183_v20 }
  0xb3   :  { %287 = vmatmul.msk.bf16.vlgmr.msrb.gmra.mxu2 %vm60_vm0, %v293_v8 }
  0xb4   :  { %v94_v21 = vpop.f32.mrf.mxu0 }
  0xb5   :  { %v102_v22 = vpack.c.bf16 %v94_v21, %v94_v21 }
  0xb7   :  { %v200_v23 = vsel %vm113_vm1, %v102_v22, 0 }
  0xb8   :  { %209 = vmatpush.bf16.msrb.mxu3 %v200_v23 }
  0xbb   :  { %288 = vmatmul.msk.bf16.vlgmr.msrb.gmra.mxu3 %vm60_vm0, %v293_v8 }
 0x110   :  { %v126_v24 = vpop.f32.mrf.mxu1 }
 0x111   :  { %v216_v25 = vpack.c.bf16 %v126_v24, %v126_v24 }
 0x113   :  { %229 = vst.msk [vmem:[#allocation5] sm:$0xf] %vm228_vm2, %v216_v25 }
 0x118   :  { %v128_v26 = vpop.f32.mrf.mxu1 }
 0x119   :  { %v217_v27 = vpack.c.bf16 %v128_v26, %v128_v26 }
 0x11b   :  { %230 = vst.msk [vmem:[#allocation5 + $0x4] sm:$0xf] %vm228_vm2, %v217_v27 }
 0x11e   :  { %v143_v28 = vpop.f32.mrf.mxu2 }
 0x11f   :  { %v218_v29 = vpack.c.bf16 %v143_v28, %v143_v28 }
 0x121   :  { %231 = vst.msk [vmem:[#allocation5 + $0x8] sm:$0xf] %vm228_vm2, %v218_v29 }
 0x126   :  { %v160_v30 = vpop.f32.mrf.mxu3  ;;  %v145_v31 = vpop.f32.mrf.mxu2 }
 0x127   :  { %v220_v32 = vpack.c.bf16 %v160_v30, %v160_v30  ;;  %v219_v33 = vpack.c.bf16 %v145_v31, %v145_v31 }
 0x128   :  { %v177_v34 = vpop.f32.mrf.mxu1 }
 0x129   :  { %233 = vst.msk [vmem:[#allocation5 + $0x10] sm:$0xf] %vm228_vm2, %v220_v32  ;;  %v222_v35 = vpack.c.bf16 %v177_v34, %v177_v34 }
 0x12a   :  { %232 = vst.msk [vmem:[#allocation5 + $0xc] sm:$0xf] %vm228_vm2, %v219_v33 }
 0x12b   :  { %235 = vst.msk [vmem:[#allocation5 + $0x18] sm:$0xf] %vm228_vm2, %v222_v35 }
 0x12e   :  { %v162_v36 = vpop.f32.mrf.mxu3 }
 0x12f   :  { %v221_v37 = vpack.c.bf16 %v162_v36, %v162_v36 }
 0x130   :  { %v179_v38 = vpop.f32.mrf.mxu1 }
 0x131   :  { %234 = vst.msk [vmem:[#allocation5 + $0x14] sm:$0xf] %vm228_vm2, %v221_v37  ;;  %v223_v39 = vpack.c.bf16 %v179_v38, %v179_v38 }
 0x133   :  { %236 = vst.msk [vmem:[#allocation5 + $0x1c] sm:$0xf] %vm228_vm2, %v223_v39 }
 0x136   :  { %v194_v40 = vpop.f32.mrf.mxu2 }
 0x137   :  { %v224_v41 = vpack.c.bf16 %v194_v40, %v194_v40 }
 0x139   :  { %237 = vst.msk [vmem:[#allocation5 + $0x20] sm:$0xf] %vm228_vm2, %v224_v41 }
 0x13e   :  { %v211_v42 = vpop.f32.mrf.mxu3  ;;  %v196_v43 = vpop.f32.mrf.mxu2 }
 0x13f   :  { %v226_v44 = vpack.c.bf16 %v211_v42, %v211_v42  ;;  %v225_v45 = vpack.c.bf16 %v196_v43, %v196_v43 }
 0x141   :  { %239 = vst.msk [vmem:[#allocation5 + $0x28] sm:$0xf] %vm228_vm2, %v226_v44 }
 0x142   :  { %238 = vst.msk [vmem:[#allocation5 + $0x24] sm:$0xf] %vm228_vm2, %v225_v45 }
 0x146   :  { %v213_v46 = vpop.f32.mrf.mxu3 }
 0x147   :  { %v227_v47 = vpack.c.bf16 %v213_v46, %v213_v46 }
 0x149   :  { %240 = vst.msk [vmem:[#allocation5 + $0x2c] sm:$0xf] %vm228_vm2, %v227_v47 }
 0x14a   :  { %253 = dma.vmem_to_hbm [thread:$0]  %s246_s21, 768, %s248_s24, [#allocation4], %s351_s17, %s351_s17, %s352_s18  }
 0x14b   :  { %348 = dma.done.wait [#allocation4], 768  }
 0x14c   :  { %349 = vsyncadd [#allocation4], 4294966528 }
 0x14d   :  { %258 = vsyncpa [#allocation3], 1 }
 0x14e   :  { %259 = vsyncpa [#allocation4], 1 }

</bundles_post_ra>
